<compile_context>
chip_gen: v7x
topology: tpu7x:2x2x1
jax: 0.10.0
libtpu: 0.0.40
codegen_flags: <defaults>
</compile_context>

<pallas_src>
import jax
import jax.numpy as jnp
from jax.experimental import pallas as pl
from jax.experimental.pallas import tpu as pltpu


def _round_up(x, m):
    return ((x + m - 1) // m) * m


def _ncf_kernel(
    s_ref,      # [TB, 2D] bf16   gathered scientist rows: [s_mlp | s_gmf]
    p_ref,      # [TB, 2D] bf16   gathered paper rows:     [p_mlp | p_gmf]
    w1s_ref,    # [2D, H1] f32    rows: [W1[:D, :] ; 0]   (scientist half of concat)
    w1p_ref,    # [2D, H1] f32    rows: [W1[D:, :] ; 0]   (paper half of concat)
    b1_ref,     # [1, H1]  f32
    w2_ref,     # [H1, H2] f32
    b2_ref,     # [1, H2]  f32
    wom_ref,    # [1, H2]  f32    output weights for the MLP half of the concat
    wog_ref,    # [1, 2D]  f32    output weights: [0(D) | wo_gmf(D)]
    bo_ref,     # [1, 1]   f32
    out_ref,    # [TB, 1]  f32
):
    # Upconvert the bf16 embedding rows once; all accumulation stays in f32.
    s = s_ref[...].astype(jnp.float32)
    p = p_ref[...].astype(jnp.float32)

    # ---- MLP branch -------------------------------------------------------
    # concat([s_mlp, p_mlp]) @ W1 computed as s_cat @ [W1a;0] + p_cat @ [W1b;0].
    # The zero rows kill the GMF halves, so no lane-dim slicing is needed.
    h = (
        jnp.dot(s, w1s_ref[...], preferred_element_type=jnp.float32)
        + jnp.dot(p, w1p_ref[...], preferred_element_type=jnp.float32)
        + b1_ref[...]
    )
    h = jnp.maximum(h, 0.0)  # ReLU (Dropout(0.2) is identity at inference)

    h = jnp.dot(h, w2_ref[...], preferred_element_type=jnp.float32) + b2_ref[...]
    h = jnp.maximum(h, 0.0)

    # ---- Output head on VPU/XLU (no N=1 MXU matmuls) ----------------------
    # concat([h, gmf]) @ Wo + bo, with gmf = s_gmf * p_gmf fused into the
    # second reduction (the zero half of wog masks the s_mlp*p_mlp lanes).
    y = (
        jnp.sum(h * wom_ref[...], axis=-1, keepdims=True)
        + jnp.sum(s * p * wog_ref[...], axis=-1, keepdims=True)
        + bo_ref[...]
    )
    out_ref[...] = jnp.maximum(y, 0.0)


def prepare_inference_params(params, table_dtype=jnp.bfloat16):
    """One-time re-layout of module parameters for the kernel."""
    dim = params["scientist_emb_mlp"].shape[1]
    h1 = params["b1"].shape[0]
    h2 = params["b2"].shape[0]

    w1 = params["w1"].astype(jnp.float32)          # [2D, H1]
    wo = params["wo"].astype(jnp.float32)          # [H2 + D, 1]
    zeros_dh1 = jnp.zeros((dim, h1), jnp.float32)

    return {
        # Pre-concatenated embedding tables: one gather per id, bf16 storage.
        "table_s": jnp.concatenate(
            [params["scientist_emb_mlp"], params["scientist_vec_gmf"]], axis=-1
        ).astype(table_dtype),
        "table_p": jnp.concatenate(
            [params["paper_emb_mlp"], params["paper_vec_gmf"]], axis=-1
        ).astype(table_dtype),
        # First Linear, zero-padded halves so [TB, 2D] rows feed it directly.
        "w1s": jnp.concatenate([w1[:dim], zeros_dh1], axis=0),   # [2D, H1]
        "w1p": jnp.concatenate([w1[dim:], zeros_dh1], axis=0),   # [2D, H1]
        "b1": params["b1"].reshape(1, h1).astype(jnp.float32),
        "w2": params["w2"].astype(jnp.float32),
        "b2": params["b2"].reshape(1, h2).astype(jnp.float32),
        # Output head as row vectors for the VPU/XLU reduction.
        "wo_mlp": wo[:h2, 0].reshape(1, h2),
        "wo_gmf": jnp.concatenate(
            [jnp.zeros((dim,), jnp.float32), wo[h2:, 0]]
        ).reshape(1, 2 * dim),
        "bo": params["bo"].reshape(1, 1).astype(jnp.float32),
    }


def ncf_forward(sid, pid, prep, *, block_rows=2048):
    """Reproduces NeuralCollaborativeFilteringModel.forward.

    sid, pid: int32 [B].  Returns float32 [B].
    """
    B = sid.shape[0]
    D2 = prep["table_s"].shape[1]      # 2 * dim
    H1 = prep["b1"].shape[1]
    H2 = prep["b2"].shape[1]

    # Batch tile: multiple of 16 (bf16 sublane packing), capped at block_rows.
    tb = min(block_rows, _round_up(B, 16))
    b_pad = pl.cdiv(B, tb) * tb
    if b_pad != B:
        zpad = jnp.zeros((b_pad - B,), sid.dtype)
        sid = jnp.concatenate([sid, zpad])
        pid = jnp.concatenate([pid, zpad])

    # Embedding gathers (glue, not the hot path): compact bf16 [B_pad, 2D].
    s_cat = prep["table_s"][sid]
    p_cat = prep["table_p"][pid]

    batch_spec = pl.BlockSpec((tb, D2), lambda i: (i, 0))

    def resident(shape):
        # Constant index map -> block stays resident in VMEM across the grid.
        return pl.BlockSpec(shape, lambda i: (0, 0))

    out = pl.pallas_call(
        _ncf_kernel,
        out_shape=jax.ShapeDtypeStruct((b_pad, 1), jnp.float32),
        grid=(b_pad // tb,),
        in_specs=[
            batch_spec,                 # scientist rows
            batch_spec,                 # paper rows
            resident((D2, H1)),         # w1s
            resident((D2, H1)),         # w1p
            resident((1, H1)),          # b1
            resident((H1, H2)),         # w2
            resident((1, H2)),          # b2
            resident((1, H2)),          # wo_mlp
            resident((1, D2)),          # wo_gmf
            resident((1, 1)),           # bo
        ],
        out_specs=pl.BlockSpec((tb, 1), lambda i: (i, 0)),
        compiler_params=pltpu.CompilerParams(
            dimension_semantics=("parallel",),   # megacore sharding on the batch axis
        ),
    )(
        s_cat, p_cat,
        prep["w1s"], prep["w1p"], prep["b1"],
        prep["w2"], prep["b2"],
        prep["wo_mlp"], prep["wo_gmf"], prep["bo"],
    )
    return out[:B, 0]  # squeeze(-1), drop batch padding


def init_params(key, num_scientists, num_papers, dim, hidden_dims=(32, 16)):
    """Deterministic synthetic parameters matching the module's shapes (f32)."""
    ks = jax.random.split(key, 10)
    h1, h2 = hidden_dims

    def u(k, shape, scale):
        return jax.random.uniform(k, shape, jnp.float32, -scale, scale)

    return {
        "scientist_emb_mlp": jax.random.normal(ks[0], (num_scientists, dim), jnp.float32),
        "paper_emb_mlp":     jax.random.normal(ks[1], (num_papers, dim), jnp.float32),
        "scientist_vec_gmf": jax.random.normal(ks[2], (num_scientists, dim), jnp.float32),
        "paper_vec_gmf":     jax.random.normal(ks[3], (num_papers, dim), jnp.float32),
        # Linear(2*dim -> h1)
        "w1": u(ks[4], (2 * dim, h1), (1.0 / (2 * dim)) ** 0.5),
        "b1": u(ks[5], (h1,), (1.0 / (2 * dim)) ** 0.5),
        # Linear(h1 -> h2)
        "w2": u(ks[6], (h1, h2), (1.0 / h1) ** 0.5),
        "b2": u(ks[7], (h2,), (1.0 / h1) ** 0.5),
        # Linear(h2 + dim -> 1); rows ordered [mlp_out (h2) ; gmf (dim)]
        "wo": u(ks[8], (h2 + dim, 1), (1.0 / (h2 + dim)) ** 0.5),
        "bo": u(ks[9], (1,), (1.0 / (h2 + dim)) ** 0.5),
    }


def _reference(sid, pid, params, table_dtype=jnp.bfloat16):
    """Pure-JAX reference (same bf16 table storage as the kernel path)."""
    def tbl(name):
        return params[name].astype(table_dtype).astype(jnp.float32)

    s_mlp = tbl("scientist_emb_mlp")[sid]
    p_mlp = tbl("paper_emb_mlp")[pid]
    gmf = tbl("scientist_vec_gmf")[sid] * tbl("paper_vec_gmf")[pid]
    x = jnp.concatenate([s_mlp, p_mlp], axis=-1)
    x = jnp.maximum(x @ params["w1"] + params["b1"], 0.0)
    x = jnp.maximum(x @ params["w2"] + params["b2"], 0.0)
    x = jnp.concatenate([x, gmf], axis=-1)
    x = jnp.maximum(x @ params["wo"] + params["bo"], 0.0)
    return x[:, 0]


if __name__ == "__main__":
    key = jax.random.PRNGKey(0)
    k_params, k_sid, k_pid = jax.random.split(key, 3)

    NUM_SCIENTISTS, NUM_PAPERS, DIM = 10, 12, 16
    HIDDEN = (32, 16)
    B = 8

    params = init_params(k_params, NUM_SCIENTISTS, NUM_PAPERS, DIM, HIDDEN)
    prep = prepare_inference_params(params)

    sid = jax.random.randint(k_sid, (B,), 0, NUM_SCIENTISTS, dtype=jnp.int32)
    pid = jax.random.randint(k_pid, (B,), 0, NUM_PAPERS, dtype=jnp.int32)

    out = jax.block_until_ready(ncf_forward(sid, pid, prep))
    ref = jax.block_until_ready(_reference(sid, pid, params))

    assert out.shape == (B,), out.shape
    # Small tolerance slack for MXU default matmul precision / summation order.
    assert jnp.allclose(out, ref, atol=1e-3, rtol=1e-3), (out, ref)
    print("KERNEL_OK")
</pallas_src>

<mosaic_0001>
module attributes {stable_mosaic.version = 11 : i64} {
  func.func @_ncf_kernel(%arg0: i32, %arg1: memref<16x32xbf16, #tpu.memory_space<vmem>>, %arg2: memref<16x32xbf16, #tpu.memory_space<vmem>>, %arg3: memref<32x32xf32, #tpu.memory_space<vmem>>, %arg4: memref<32x32xf32, #tpu.memory_space<vmem>>, %arg5: memref<1x32xf32, #tpu.memory_space<vmem>>, %arg6: memref<32x16xf32, #tpu.memory_space<vmem>>, %arg7: memref<1x16xf32, #tpu.memory_space<vmem>>, %arg8: memref<1x16xf32, #tpu.memory_space<vmem>>, %arg9: memref<1x32xf32, #tpu.memory_space<vmem>>, %arg10: memref<1x1xf32, #tpu.memory_space<vmem>>, %arg11: memref<16x1xf32, #tpu.memory_space<vmem>>) attributes {dimension_semantics = [#tpu.dimension_semantics<parallel>], iteration_bounds = array<i64: 1>, scalar_prefetch = 0 : i64, scratch_operands = 0 : i64, tpu.core_type = #tpu.core_type<tc>, window_params = [{transform_indices = @transform_0, window_bounds = array<i64: 16, 32>}, {transform_indices = @transform_1, window_bounds = array<i64: 16, 32>}, {pipeline_mode = #tpu.pipeline_mode<synchronous>, transform_indices = @transform_2, window_bounds = array<i64: 32, 32>}, {pipeline_mode = #tpu.pipeline_mode<synchronous>, transform_indices = @transform_3, window_bounds = array<i64: 32, 32>}, {pipeline_mode = #tpu.pipeline_mode<synchronous>, transform_indices = @transform_4, window_bounds = array<i64: 1, 32>}, {pipeline_mode = #tpu.pipeline_mode<synchronous>, transform_indices = @transform_5, window_bounds = array<i64: 32, 16>}, {pipeline_mode = #tpu.pipeline_mode<synchronous>, transform_indices = @transform_6, window_bounds = array<i64: 1, 16>}, {pipeline_mode = #tpu.pipeline_mode<synchronous>, transform_indices = @transform_7, window_bounds = array<i64: 1, 16>}, {pipeline_mode = #tpu.pipeline_mode<synchronous>, transform_indices = @transform_8, window_bounds = array<i64: 1, 32>}, {pipeline_mode = #tpu.pipeline_mode<synchronous>, transform_indices = @transform_9, window_bounds = array<i64: 1, 1>}, {transform_indices = @transform_10, window_bounds = array<i64: 16, 1>}]} {
    %c0 = arith.constant 0 : index
    %c0_0 = arith.constant 0 : index
    %0 = vector.load %arg1[%c0, %c0_0] : memref<16x32xbf16, #tpu.memory_space<vmem>>, vector<16x32xbf16>
    %1 = arith.extf %0 : vector<16x32xbf16> to vector<16x32xf32>
    %c0_1 = arith.constant 0 : index
    %c0_2 = arith.constant 0 : index
    %2 = vector.load %arg2[%c0_1, %c0_2] : memref<16x32xbf16, #tpu.memory_space<vmem>>, vector<16x32xbf16>
    %3 = arith.extf %2 : vector<16x32xbf16> to vector<16x32xf32>
    %c0_3 = arith.constant 0 : index
    %c0_4 = arith.constant 0 : index
    %4 = vector.load %arg3[%c0_3, %c0_4] : memref<32x32xf32, #tpu.memory_space<vmem>>, vector<32x32xf32>
    %cst = arith.constant dense<0.000000e+00> : vector<16x32xf32>
    %5 = tpu.matmul %1, %4, %cst {dimension_numbers = #tpu.dot_dimension_numbers<[1], [0], [0], [1], [0, 0, 1, 1], [], []>} : vector<16x32xf32>, vector<32x32xf32>, vector<16x32xf32> -> vector<16x32xf32>
    %c0_5 = arith.constant 0 : index
    %c0_6 = arith.constant 0 : index
    %6 = vector.load %arg4[%c0_5, %c0_6] : memref<32x32xf32, #tpu.memory_space<vmem>>, vector<32x32xf32>
    %cst_7 = arith.constant dense<0.000000e+00> : vector<16x32xf32>
    %7 = tpu.matmul %3, %6, %cst_7 {dimension_numbers = #tpu.dot_dimension_numbers<[1], [0], [0], [1], [0, 0, 1, 1], [], []>} : vector<16x32xf32>, vector<32x32xf32>, vector<16x32xf32> -> vector<16x32xf32>
    %8 = arith.addf %5, %7 : vector<16x32xf32>
    %c0_8 = arith.constant 0 : index
    %c0_9 = arith.constant 0 : index
    %9 = vector.load %arg5[%c0_8, %c0_9] : memref<1x32xf32, #tpu.memory_space<vmem>>, vector<1x32xf32>
    %10 = vector.broadcast %9 : vector<1x32xf32> to vector<16x32xf32>
    %11 = arith.addf %8, %10 : vector<16x32xf32>
    %cst_10 = arith.constant 0.000000e+00 : f32
    %12 = vector.broadcast %cst_10 : f32 to vector<16x32xf32>
    %13 = arith.maximumf %11, %12 : vector<16x32xf32>
    %c0_11 = arith.constant 0 : index
    %c0_12 = arith.constant 0 : index
    %14 = vector.load %arg6[%c0_11, %c0_12] : memref<32x16xf32, #tpu.memory_space<vmem>>, vector<32x16xf32>
    %cst_13 = arith.constant dense<0.000000e+00> : vector<16x16xf32>
    %15 = tpu.matmul %13, %14, %cst_13 {dimension_numbers = #tpu.dot_dimension_numbers<[1], [0], [0], [1], [0, 0, 1, 1], [], []>} : vector<16x32xf32>, vector<32x16xf32>, vector<16x16xf32> -> vector<16x16xf32>
    %c0_14 = arith.constant 0 : index
    %c0_15 = arith.constant 0 : index
    %16 = vector.load %arg7[%c0_14, %c0_15] : memref<1x16xf32, #tpu.memory_space<vmem>>, vector<1x16xf32>
    %17 = vector.broadcast %16 : vector<1x16xf32> to vector<16x16xf32>
    %18 = arith.addf %15, %17 : vector<16x16xf32>
    %cst_16 = arith.constant 0.000000e+00 : f32
    %19 = vector.broadcast %cst_16 : f32 to vector<16x16xf32>
    %20 = arith.maximumf %18, %19 : vector<16x16xf32>
    %c0_17 = arith.constant 0 : index
    %c0_18 = arith.constant 0 : index
    %21 = vector.load %arg8[%c0_17, %c0_18] : memref<1x16xf32, #tpu.memory_space<vmem>>, vector<1x16xf32>
    %22 = vector.broadcast %21 : vector<1x16xf32> to vector<16x16xf32>
    %23 = arith.mulf %20, %22 : vector<16x16xf32>
    %cst_19 = arith.constant dense<0.000000e+00> : vector<16xf32>
    %24 = vector.multi_reduction <add>, %23, %cst_19 [1] : vector<16x16xf32> to vector<16xf32>
    %25 = vector.shape_cast %24 : vector<16xf32> to vector<16x1xf32>
    %26 = arith.mulf %1, %3 : vector<16x32xf32>
    %c0_20 = arith.constant 0 : index
    %c0_21 = arith.constant 0 : index
    %27 = vector.load %arg9[%c0_20, %c0_21] : memref<1x32xf32, #tpu.memory_space<vmem>>, vector<1x32xf32>
    %28 = vector.broadcast %27 : vector<1x32xf32> to vector<16x32xf32>
    %29 = arith.mulf %26, %28 : vector<16x32xf32>
    %cst_22 = arith.constant dense<0.000000e+00> : vector<16xf32>
    %30 = vector.multi_reduction <add>, %29, %cst_22 [1] : vector<16x32xf32> to vector<16xf32>
    %31 = vector.shape_cast %30 : vector<16xf32> to vector<16x1xf32>
    %32 = arith.addf %25, %31 : vector<16x1xf32>
    %c0_23 = arith.constant 0 : index
    %c0_24 = arith.constant 0 : index
    %33 = vector.load %arg10[%c0_23, %c0_24] : memref<1x1xf32, #tpu.memory_space<vmem>>, vector<1x1xf32>
    %34 = vector.broadcast %33 : vector<1x1xf32> to vector<16x1xf32>
    %35 = arith.addf %32, %34 : vector<16x1xf32>
    %cst_25 = arith.constant 0.000000e+00 : f32
    %36 = vector.broadcast %cst_25 : f32 to vector<16x1xf32>
    %37 = arith.maximumf %35, %36 : vector<16x1xf32>
    %c0_26 = arith.constant 0 : index
    %c0_27 = arith.constant 0 : index
    %38 = vector.load %arg11[%c0_26, %c0_27] : memref<16x1xf32, #tpu.memory_space<vmem>>, vector<16x1xf32>
    tpu.vector_store %arg11[%c0_26, %c0_27], %37 {strides = array<i32>} : memref<16x1xf32, #tpu.memory_space<vmem>>, vector<16x1xf32>,
    return
  }
  func.func @transform_0(%arg0: i32) -> (i32, i32) {
    %c0_i32 = arith.constant 0 : i32
    %c0_i32_0 = arith.constant 0 : i32
    return %arg0, %c0_i32 : i32, i32
  }
  func.func @transform_1(%arg0: i32) -> (i32, i32) {
    %c0_i32 = arith.constant 0 : i32
    %c0_i32_0 = arith.constant 0 : i32
    return %arg0, %c0_i32 : i32, i32
  }
  func.func @transform_2(%arg0: i32) -> (i32, i32) {
    %c0_i32 = arith.constant 0 : i32
    %c0_i32_0 = arith.constant 0 : i32
    %c0_i32_1 = arith.constant 0 : i32
    return %c0_i32, %c0_i32_0 : i32, i32
  }
  func.func @transform_3(%arg0: i32) -> (i32, i32) {
    %c0_i32 = arith.constant 0 : i32
    %c0_i32_0 = arith.constant 0 : i32
    %c0_i32_1 = arith.constant 0 : i32
    return %c0_i32, %c0_i32_0 : i32, i32
  }
  func.func @transform_4(%arg0: i32) -> (i32, i32) {
    %c0_i32 = arith.constant 0 : i32
    %c0_i32_0 = arith.constant 0 : i32
    %c0_i32_1 = arith.constant 0 : i32
    return %c0_i32, %c0_i32_0 : i32, i32
  }
  func.func @transform_5(%arg0: i32) -> (i32, i32) {
    %c0_i32 = arith.constant 0 : i32
    %c0_i32_0 = arith.constant 0 : i32
    %c0_i32_1 = arith.constant 0 : i32
    return %c0_i32, %c0_i32_0 : i32, i32
  }
  func.func @transform_6(%arg0: i32) -> (i32, i32) {
    %c0_i32 = arith.constant 0 : i32
    %c0_i32_0 = arith.constant 0 : i32
    %c0_i32_1 = arith.constant 0 : i32
    return %c0_i32, %c0_i32_0 : i32, i32
  }
  func.func @transform_7(%arg0: i32) -> (i32, i32) {
    %c0_i32 = arith.constant 0 : i32
    %c0_i32_0 = arith.constant 0 : i32
    %c0_i32_1 = arith.constant 0 : i32
    return %c0_i32, %c0_i32_0 : i32, i32
  }
  func.func @transform_8(%arg0: i32) -> (i32, i32) {
    %c0_i32 = arith.constant 0 : i32
    %c0_i32_0 = arith.constant 0 : i32
    %c0_i32_1 = arith.constant 0 : i32
    return %c0_i32, %c0_i32_0 : i32, i32
  }
  func.func @transform_9(%arg0: i32) -> (i32, i32) {
    %c0_i32 = arith.constant 0 : i32
    %c0_i32_0 = arith.constant 0 : i32
    %c0_i32_1 = arith.constant 0 : i32
    return %c0_i32, %c0_i32_0 : i32, i32
  }
  func.func @transform_10(%arg0: i32) -> (i32, i32) {
    %c0_i32 = arith.constant 0 : i32
    %c0_i32_0 = arith.constant 0 : i32
    return %arg0, %c0_i32 : i32, i32
  }
}

</mosaic_0001>

<bundles_post_ra>
// kernel: tpu_custom_call.1
= control target key start
LH: loop header
LB: loop body
LE: loop exit
PB: predicated region body
PF: predicated region fallthrough
CT: control target
= control target key end

     0   :  { %s641_s0 = inlined_call_operand.vmem [shape: bf16[16,32], index: 0, kind: input, shape index: {}]   ;;  %s642_s1 = inlined_call_operand.vmem [shape: bf16[16,32], index: 1, kind: input, shape index: {}]   ;;  %s643_s2 = inlined_call_operand.vmem [shape: f32[32,32], index: 2, kind: input, shape index: {}]   ;;  %s644_s3 = inlined_call_operand.hbm [shape: f32[32,32], index: 3, kind: input, shape index: {}]   ;;  %s645_s4 = inlined_call_operand.vmem [shape: f32[1,32], index: 4, kind: input, shape index: {}]   ;;  %s646_s5 = inlined_call_operand.vmem [shape: f32[32,16], index: 5, kind: input, shape index: {}]   ;;  %s647_s6 = inlined_call_operand.vmem [shape: f32[1,16], index: 6, kind: input, shape index: {}]   ;;  %s648_s7 = inlined_call_operand.vmem [shape: f32[1,16], index: 7, kind: input, shape index: {}]   ;;  %s649_s8 = inlined_call_operand.vmem [shape: f32[1,32], index: 8, kind: input, shape index: {}]   ;;  %s650_s9 = inlined_call_operand.<no memory space> [shape: f32[1,1], index: 9, kind: input, shape index: {}]   ;;  %s651_s10 = inlined_call_operand.vmem [shape: f32[16,1], index: 10, kind: output, shape index: {}]  }
   0x1   :  { %v15_v0 = vstv %s650_s9 }
   0x2   :  { %16 = vst [vmem:[#allocation2] sm:$0x1] %v15_v0 }
   0x3   :  { %17 = vsyncpa [#allocation4], 0  ;;  %s512_s15 = smov [#allocation3]   ;;  %s488_s19 = scalar_lea.hbm %s644_s3, 512 }
   0x4   :  { %s29_s16 = sshll.u32 %s512_s15, 4  ;;  %p489_p0 = scmp.ne.s32.totalorder %s644_s3, %s488_s19  ;;  %s30_s16 = int_to_ptr.vmem [resolvable:$true] %s29_s16 }
   0x5   :  { %p492_p1 = scmp.lt.u32.totalorder %s488_s19, %s644_s3 }
   0x7   :  { %p494_p2 = pnand %p492_p1, %p489_p0 }
   0x9   :  { %497 = shalt.err (!%p494_p2)
}
   0xa   :  { %s498_s9 = scalar_lea.vmem %s30_s16, 512  ;;  %p503_p4 = scmp.lt.s32.totalorder %s30_s16, %s30_s16 }
   0xb   :  { %p499_p3 = scmp.ne.s32.totalorder %s30_s16, %s498_s9  ;;  %p504_p5 = scmp.lt.s32.totalorder %s498_s9, %s498_s9 }
   0xd   :  { %p505_p6 = por %p504_p5, %p503_p4 }
   0xf   :  { %p506_p7 = pnand %p505_p6, %p499_p3 }
  0x11   :  { %509 = shalt.err (!%p506_p7)
}
  0x12   :  { %s513_s24 = smov 128   ;;  %s514_s25 = smov 8  }
  0x13   :  { %35 = dma.hbm_to_vmem [thread:$0]  %s644_s3, 512, %s30_s16, [#allocation4], %s513_s24, %s513_s24, %s514_s25  }
  0x14   :  { %510 = dma.done.wait [#allocation4], 512  }
  0x15   :  { %511 = vsyncadd [#allocation4], 4294966784  ;;  %v63_v1 = vld [vmem:[#allocation3] sm:$0xff]  ;;  %v64_v2 = vld [vmem:[#allocation3 + $0x8] sm:$0xff]  ;;  %vm67_vm0 = vcmask 261120   ;;  %vm344_vm1 = vcmask 130048  }
  0x16   :  { %v65_v3 = vld [vmem:[#allocation3 + $0x10] sm:$0xff]  ;;  %v459_v4 = vpack.c.bf16 %v64_v2, %v63_v1  ;;  %v66_v5 = vld [vmem:[#allocation3 + $0x18] sm:$0xff]  ;;  %v60_v12 = vld [vmem:[%s643_s2 + $0x8] sm:$0xff]  ;;  %vm381_vm2 = vcmask 7168  }
  0x17   :  { %v401_v6 = vld [vmem:[%s641_s0] sm:$0xff]   ;;  %v463_v8 = vpack.c.bf16 %v66_v5, %v65_v3  ;;  %v242_v14 = vld [vmem:[%s646_s5 + $0x8] sm:$0xff]  ;;  %v61_v18 = vld [vmem:[%s643_s2 + $0x10] sm:$0xff] }
  0x18   :  { %v405_v7 = vld [vmem:[%s642_s1] sm:$0xff]   ;;  %v402_v9 = vunpack.c.l.bf16 %v401_v6  ;;  %460 = vmatprep.subr.bf16.mxu0 %v459_v4  ;;  %v62_v19 = vld [vmem:[%s643_s2 + $0x18] sm:$0xff]  ;;  %v403_v22 = vunpack.c.h.bf16 %v401_v6  ;;  %v243_v23 = vld [vmem:[%s646_s5 + $0x10] sm:$0xff] }
  0x19   :  { %v406_v10 = vunpack.c.l.bf16 %v405_v7  ;;  %v59_v11 = vld [vmem:[%s643_s2] sm:$0xff]  ;;  %462 = vmatpush3.bf16.msra.mxu0 %v459_v4  ;;  %v407_v20 = vunpack.c.h.bf16 %v405_v7  ;;  %v471_v21 = vpack.c.bf16 %v62_v19, %v61_v18  ;;  %v244_v24 = vld [vmem:[%s646_s5 + $0x18] sm:$0xff] }
  0x1a   :  { %v241_v13 = vld [vmem:[%s646_s5] sm:$0xff]  ;;  %464 = vmatprep.subr.bf16.mxu0 %v463_v8  ;;  %v467_v17 = vpack.c.bf16 %v60_v12, %v59_v11  ;;  %v479_v25 = vpack.c.bf16 %v244_v24, %v243_v23 }
  0x1b   :  { %434 = vmatprep.mubr.msk.f32.mxu0 %vm67_vm0, %v406_v10  ;;  %v351_v15 = vmul.f32 %v406_v10, %v402_v9  ;;  %v475_v16 = vpack.c.bf16 %v242_v14, %v241_v13  ;;  %v393_v26 = vld [vmem:[%s645_s4] ss:$0 sm:$0xff]  ;;  %v352_v36 = vmul.f32 %v407_v20, %v403_v22 }
  0x1c   :  { %v398_v33 = vld [vmem:[%s649_s8] ss:$0 sm:$0xff] }
  0x1d   :  { %476 = vmatprep.subr.bf16.mxu1 %v475_v16  ;;  %466 = vmatpush3.bf16.msra.mxu0 %v463_v8  ;;  %v360_v34 = vmul.f32 %v398_v33, %v351_v15  ;;  %v361_v37 = vmul.f32 %v398_v33, %v352_v36  ;;  %v394_v39 = vld [vmem:[%s647_s6] ss:$0 sm:$0xff] }
  0x1e   :  { %478 = vmatpush3.bf16.msra.mxu1 %v475_v16  ;;  %468 = vmatprep.subr.bf16.mxu0 %v467_v17  ;;  %v397_v44 = vld [vmem:[%s648_s7] ss:$0 sm:$0xff] }
  0x1f   :  { %480 = vmatprep.subr.bf16.mxu1 %v479_v25  ;;  %v362_v35 = vsel %vm67_vm0, %v360_v34, 0.0  ;;  %v365_v38 = vsel %vm67_vm0, %v361_v37, 0.0  ;;  %v399_v52 = vld [vmem:[#allocation2] ss:$0 sm:$0xff] }
  0x20   :  { %435 = vmatmul.mubr.msk.f32.vlgmr.msra.gmra.mrb[0].mxu0 %vm67_vm0, %v407_v20  ;;  %363 = vadd.xlane.f32.xlu1 %v362_v35 }
  0x21   :  { %470 = vmatpush3.bf16.msra.mxu0 %v467_v17  ;;  %445 = vmatprep.mubr.msk.f32.mxu0 %vm67_vm0, %v402_v9 }
  0x22   :  { %472 = vmatprep.subr.bf16.mxu0 %v471_v21  ;;  %482 = vmatpush3.bf16.msra.mxu1 %v479_v25 }
  0x24   :  { %366 = vadd.xlane.f32.xlu1 %v365_v38 }
  0x25   :  { %474 = vmatpush3.bf16.msra.mxu0 %v471_v21 }
  0x28   :  { %446 = vmatmul.mubr.msk.f32.vlgmr.msra.gmra.mrb[0].mxu0 %vm67_vm0, %v403_v22 }
  0xad   :  { %v364_v51 = vpop.xlane.xlu1 %363 }
  0xb1   :  { %v367_v55 = vpop.xlane.xlu1 %366 }
  0xfb   :  { %v447_v27 = vpop.f32.mrb[0].mxu0 }
  0xfc   :  { %v238_v28 = vadd.f32 %v447_v27, %v393_v26  ;;  %v221_v29 = vpop.f32.mrb[1].mxu0 }
  0xfd   :  { %v237_v30 = vadd.f32 %v393_v26, %v221_v29 }
  0xfe   :  { %v240_v32 = vmax.f32 %v238_v28, 0.0 }
  0xff   :  { %v239_v31 = vmax.f32 %v237_v30, 0.0 }
 0x101   :  { %456 = vmatprep.mubr.msk.f32.mxu1 %vm67_vm0, %v239_v31 }
 0x102   :  { %457 = vmatmul.mubr.msk.f32.vlgmr.msra.gmra.mrb[0].mxu1 %vm67_vm0, %v240_v32 }
 0x1d5   :  { %v458_v40 = vpop.f32.mrb[0].mxu1 }
 0x1d6   :  { %v330_v41 = vadd.f32 %v458_v40, %v394_v39  ;;  %v324_v42 = vpop.f32.mrb[1].mxu1 }
 0x1d7   :  { %v325_v43 = vadd.f32 %v394_v39, %v324_v42 }
 0x1d8   :  { %v334_v45 = vmax.f32 %v330_v41, 0.0 }
 0x1d9   :  { %v333_v46 = vmax.f32 %v325_v43, 0.0 }
 0x1da   :  { %v343_v49 = vmul.f32 %v397_v44, %v334_v45 }
 0x1db   :  { %v342_v47 = vmul.f32 %v397_v44, %v333_v46 }
 0x1dc   :  { %v348_v50 = vsel %vm344_vm1, %v343_v49, 0.0 }
 0x1dd   :  { %v345_v48 = vsel %vm344_vm1, %v342_v47, 0.0 }
 0x1de   :  { %346 = vadd.xlane.f32.xlu0 %v345_v48 }
 0x1e2   :  { %349 = vadd.xlane.f32.xlu0 %v348_v50 }
 0x26b   :  { %v347_v53 = vpop.xlane.xlu0 %346 }
 0x26c   :  { %v368_v54 = vadd.f32 %v364_v51, %v347_v53 }
 0x26e   :  { %v377_v56 = vadd.f32 %v399_v52, %v368_v54 }
 0x26f   :  { %v350_v57 = vpop.xlane.xlu0 %349 }
 0x270   :  { %v379_v58 = vmax.f32 %v377_v56, 0.0  ;;  %v369_v59 = vadd.f32 %v367_v55, %v350_v57 }
 0x272   :  { %382 = vst.msk [vmem:[%s651_s10] sm:$0xff] %vm381_vm2, %v379_v58  ;;  %v378_v60 = vadd.f32 %v399_v52, %v369_v59 }
 0x274   :  { %v380_v61 = vmax.f32 %v378_v60, 0.0 }
 0x276   :  { %383 = vst.msk [vmem:[%s651_s10 + $0x8] sm:$0xff] %vm381_vm2, %v380_v61 }
 0x277   :  { %388 = vsyncpa [#allocation4], 1 }

</bundles_post_ra>
